<compile_context>
chip_gen: v7x
topology: tpu7x:2x2x1
jax: 0.10.0
libtpu: 0.0.40
codegen_flags: <defaults>
</compile_context>

<pallas_src>
import functools

import jax
import jax.numpy as jnp
from jax import lax
from jax.experimental import pallas as pl
from jax.experimental.pallas import tpu as pltpu


def _round_up(x, m):
    return (x + m - 1) // m * m


# ----------------------------- Pallas kernel ------------------------------ #
def _conv_bn_relu_kernel(x_ref, w_ref, bias_ref, o_ref, *, act):
    # x_ref:    (TILE_M, K)       bf16 im2col patch tile   (K = kh*kw*in_c)
    # w_ref:    (K, OC_PAD)       bf16 conv weight with BN scale pre-folded
    # bias_ref: (1, OC_PAD)       f32  folded BN bias
    # o_ref:    (TILE_M, OC_PAD)  f32  output tile (lane-dense, OC_PAD % 128 == 0)
    acc = jnp.dot(x_ref[...], w_ref[...], preferred_element_type=jnp.float32)
    y = acc + bias_ref[...]
    if act:
        y = jnp.maximum(y, 0.0)
    o_ref[...] = y.astype(o_ref.dtype)


# ------------------------------- wrapper ---------------------------------- #
def _im2col(x_nhwc, kernel_size, padding, dilation):
    """Extract (kh, kw, c) ordered patches. Glue code, plain JAX."""
    n, h, w, c = x_nhwc.shape
    kh = kw = kernel_size
    xp = jnp.pad(x_nhwc, ((0, 0), (padding, padding), (padding, padding), (0, 0)))
    h_out = h + 2 * padding - dilation * (kh - 1)
    w_out = w + 2 * padding - dilation * (kw - 1)
    cols = []
    for i in range(kh):
        for j in range(kw):
            di, dj = i * dilation, j * dilation
            cols.append(xp[:, di:di + h_out, dj:dj + w_out, :])
    # (N, H_out, W_out, kh*kw, C) -> (N*H_out*W_out, kh*kw*C)
    patches = jnp.stack(cols, axis=3)
    return patches.reshape(n * h_out * w_out, kh * kw * c), (n, h_out, w_out)


def conv2d_forward(x_nchw, weight_oihw, gamma, beta, running_mean, running_var,
                   *, kernel_size=3, padding=1, dilation=1, act=True,
                   eps=1e-5, tile_m=512):
    """Forward of Conv2d(k=3,p=1,no-bias)+BN(eval)+ReLU. I/O layout: NCHW."""
    n, in_c, h, w = x_nchw.shape
    out_c = weight_oihw.shape[0]

    # NCHW -> NHWC (bf16) for im2col.
    x_nhwc = jnp.transpose(x_nchw, (0, 2, 3, 1)).astype(jnp.bfloat16)
    patches, (n_, h_out, w_out) = _im2col(x_nhwc, kernel_size, padding, dilation)
    m, k = patches.shape

    # Fold BatchNorm (eval) into the weight (scale) and a per-channel bias.
    inv_std = gamma / jnp.sqrt(running_var + eps)
    w_folded = weight_oihw * inv_std[:, None, None, None]
    bias = beta - running_mean * inv_std

    # (out_c, in_c, kh, kw) -> (kh, kw, in_c, out_c) -> (K, out_c), pad to 128.
    oc_pad = _round_up(max(out_c, 128), 128)
    w2d = jnp.transpose(w_folded, (2, 3, 1, 0)).reshape(k, out_c)
    w2d = jnp.pad(w2d.astype(jnp.bfloat16), ((0, 0), (0, oc_pad - out_c)))
    bias_p = jnp.pad(bias.astype(jnp.float32), (0, oc_pad - out_c)).reshape(1, oc_pad)

    # Pick an M tile: multiple of 8, bounded by a conservative VMEM budget
    # (2 double-buffered bf16 input tiles + 2 f32 output tiles << scoped VMEM
    # on v5e/v6e/v7x).  K is left untiled; add a K reduction axis + VMEM
    # accumulator (P3 pattern) only if K grows into the thousands.
    tile_m = min(_round_up(tile_m, 8), _round_up(m, 8))
    budget = 8 * 1024 * 1024
    while tile_m > 8 and (2 * tile_m * k * 2 + 2 * tile_m * oc_pad * 4) > budget:
        tile_m = _round_up(tile_m // 2, 8)
    m_pad = _round_up(m, tile_m)
    if m_pad != m:
        patches = jnp.pad(patches, ((0, m_pad - m), (0, 0)))

    out_flat = pl.pallas_call(
        functools.partial(_conv_bn_relu_kernel, act=act),
        out_shape=jax.ShapeDtypeStruct((m_pad, oc_pad), jnp.float32),
        grid=(m_pad // tile_m,),
        in_specs=[
            pl.BlockSpec((tile_m, k), lambda i: (i, 0)),
            pl.BlockSpec((k, oc_pad), lambda i: (0, 0)),
            pl.BlockSpec((1, oc_pad), lambda i: (0, 0)),
        ],
        out_specs=pl.BlockSpec((tile_m, oc_pad), lambda i: (i, 0)),
        compiler_params=pltpu.CompilerParams(
            dimension_semantics=("parallel",),
            vmem_limit_bytes=32 * 1024 * 1024),
    )(patches, w2d, bias_p)

    # (M_pad, OC_PAD) -> valid rows/channels -> NHWC -> NCHW.
    out = out_flat[:m, :out_c].reshape(n_, h_out, w_out, out_c)
    return jnp.transpose(out, (0, 3, 1, 2))


# ------------------------------ reference --------------------------------- #
def _reference(x_nchw, weight_oihw, gamma, beta, running_mean, running_var,
               *, padding=1, dilation=1, act=True, eps=1e-5):
    # Mirrors the kernel's bf16 input quantization so the comparison only
    # differs by f32 summation order.
    inv_std = gamma / jnp.sqrt(running_var + eps)
    w_folded = (weight_oihw * inv_std[:, None, None, None])
    xq = x_nchw.astype(jnp.bfloat16).astype(jnp.float32)
    wq = w_folded.astype(jnp.bfloat16).astype(jnp.float32)
    y = lax.conv_general_dilated(
        xq, wq,
        window_strides=(1, 1),
        padding=[(padding, padding), (padding, padding)],
        rhs_dilation=(dilation, dilation),
        dimension_numbers=("NCHW", "OIHW", "NCHW"),
        precision=lax.Precision.HIGHEST)
    y = y + (beta - running_mean * inv_std).reshape(1, -1, 1, 1)
    if act:
        y = jnp.maximum(y, 0.0)
    return y


# -------------------------------- main ------------------------------------ #
if __name__ == "__main__":
    key = jax.random.PRNGKey(0)
    k_x, k_w, k_g, k_b, k_m, k_v = jax.random.split(key, 6)

    # Matches ICAN's conv1/2/3 block: Conv2d(64, 32, 3, 1, 1, bias=False)
    # + BatchNorm2d(32) + ReLU, at a small spatial size.
    N, IN_C, OUT_C, H, W = 2, 64, 32, 14, 14
    KS, PAD, DIL = 3, 1, 1

    x = jax.random.normal(k_x, (N, IN_C, H, W), dtype=jnp.float32)
    weight = jax.random.normal(k_w, (OUT_C, IN_C, KS, KS), dtype=jnp.float32) * 0.1
    gamma = 1.0 + 0.2 * jax.random.normal(k_g, (OUT_C,), dtype=jnp.float32)
    beta = 0.1 * jax.random.normal(k_b, (OUT_C,), dtype=jnp.float32)
    running_mean = 0.1 * jax.random.normal(k_m, (OUT_C,), dtype=jnp.float32)
    running_var = 1.0 + 0.2 * jax.nn.sigmoid(jax.random.normal(k_v, (OUT_C,), dtype=jnp.float32))

    # tile_m=128 so the toy problem (M = 2*14*14 = 392 -> padded 512) actually
    # exercises a multi-tile grid and the M-padding path.
    out = conv2d_forward(x, weight, gamma, beta, running_mean, running_var,
                         kernel_size=KS, padding=PAD, dilation=DIL, act=True,
                         tile_m=128)
    out = jax.block_until_ready(out)

    ref = _reference(x, weight, gamma, beta, running_mean, running_var,
                     padding=PAD, dilation=DIL, act=True)
    assert out.shape == (N, OUT_C, H, W), out.shape
    assert jnp.allclose(out, ref, atol=5e-3, rtol=5e-3), "mismatch vs reference"

    print("KERNEL_OK")
</pallas_src>

<mosaic_0001>
module attributes {stable_mosaic.version = 11 : i64} {
  func.func @_conv_bn_relu_kernel(%arg0: i32, %arg1: memref<128x576xbf16, #tpu.memory_space<vmem>>, %arg2: memref<576x128xbf16, #tpu.memory_space<vmem>>, %arg3: memref<1x128xf32, #tpu.memory_space<vmem>>, %arg4: memref<128x128xf32, #tpu.memory_space<vmem>>) attributes {dimension_semantics = [#tpu.dimension_semantics<parallel>], iteration_bounds = array<i64: 4>, scalar_prefetch = 0 : i64, scratch_operands = 0 : i64, tpu.core_type = #tpu.core_type<tc>, window_params = [{transform_indices = @transform_0, window_bounds = array<i64: 128, 576>}, {pipeline_mode = #tpu.pipeline_mode<synchronous>, transform_indices = @transform_1, window_bounds = array<i64: 576, 128>}, {pipeline_mode = #tpu.pipeline_mode<synchronous>, transform_indices = @transform_2, window_bounds = array<i64: 1, 128>}, {transform_indices = @transform_3, window_bounds = array<i64: 128, 128>}]} {
    %c0 = arith.constant 0 : index
    %c0_0 = arith.constant 0 : index
    %0 = vector.load %arg1[%c0, %c0_0] : memref<128x576xbf16, #tpu.memory_space<vmem>>, vector<128x576xbf16>
    %c0_1 = arith.constant 0 : index
    %c0_2 = arith.constant 0 : index
    %1 = vector.load %arg2[%c0_1, %c0_2] : memref<576x128xbf16, #tpu.memory_space<vmem>>, vector<576x128xbf16>
    %cst = arith.constant dense<0.000000e+00> : vector<128x128xf32>
    %2 = tpu.matmul %0, %1, %cst {dimension_numbers = #tpu.dot_dimension_numbers<[1], [0], [0], [1], [0, 0, 1, 1], [], []>} : vector<128x576xbf16>, vector<576x128xbf16>, vector<128x128xf32> -> vector<128x128xf32>
    %c0_3 = arith.constant 0 : index
    %c0_4 = arith.constant 0 : index
    %3 = vector.load %arg3[%c0_3, %c0_4] : memref<1x128xf32, #tpu.memory_space<vmem>>, vector<1x128xf32>
    %4 = vector.broadcast %3 : vector<1x128xf32> to vector<128x128xf32>
    %5 = arith.addf %2, %4 : vector<128x128xf32>
    %cst_5 = arith.constant 0.000000e+00 : f32
    %6 = vector.broadcast %cst_5 : f32 to vector<128x128xf32>
    %7 = arith.maximumf %5, %6 : vector<128x128xf32>
    %c0_6 = arith.constant 0 : index
    %c0_7 = arith.constant 0 : index
    %8 = vector.load %arg4[%c0_6, %c0_7] : memref<128x128xf32, #tpu.memory_space<vmem>>, vector<128x128xf32>
    tpu.vector_store %arg4[%c0_6, %c0_7], %7 {strides = array<i32>} : memref<128x128xf32, #tpu.memory_space<vmem>>, vector<128x128xf32>,
    return
  }
  func.func @transform_0(%arg0: i32) -> (i32, i32) {
    %c0_i32 = arith.constant 0 : i32
    %c0_i32_0 = arith.constant 0 : i32
    return %arg0, %c0_i32 : i32, i32
  }
  func.func @transform_1(%arg0: i32) -> (i32, i32) {
    %c0_i32 = arith.constant 0 : i32
    %c0_i32_0 = arith.constant 0 : i32
    %c0_i32_1 = arith.constant 0 : i32
    return %c0_i32, %c0_i32_0 : i32, i32
  }
  func.func @transform_2(%arg0: i32) -> (i32, i32) {
    %c0_i32 = arith.constant 0 : i32
    %c0_i32_0 = arith.constant 0 : i32
    %c0_i32_1 = arith.constant 0 : i32
    return %c0_i32, %c0_i32_0 : i32, i32
  }
  func.func @transform_3(%arg0: i32) -> (i32, i32) {
    %c0_i32 = arith.constant 0 : i32
    %c0_i32_0 = arith.constant 0 : i32
    return %arg0, %c0_i32 : i32, i32
  }
}

</mosaic_0001>

<bundles_post_ra>
// kernel: tpu_custom_call.1
= control target key start
LH: loop header
LB: loop body
LE: loop exit
PB: predicated region body
PF: predicated region fallthrough
CT: control target
= control target key end

     0   :  { %8 = vsyncpa [#allocation3], 0  ;;  %s1968_s0 = inlined_call_operand.vmem [shape: bf16[512,576], index: 0, kind: input, shape index: {}]   ;;  %s1969_s1 = inlined_call_operand.vmem [shape: bf16[576,128], index: 1, kind: input, shape index: {}]   ;;  %s1970_s2 = inlined_call_operand.vmem [shape: f32[1,128], index: 2, kind: input, shape index: {}]   ;;  %s1971_s3 = inlined_call_operand.hbm [shape: f32[512,128], index: 3, kind: output, shape index: {}]  }
   0x1   :  { %10 = vsyncpa [#allocation3 + $0x1], 0  ;;  %s1634_s12 = smov 0   ;;  %s1636_s13 = smov 0  }
   0x2   :  { %s1638_s14 = smov 0   ;;  %s1640_s15 = smov 0  }
   0x3 LB: > { %s1655_s16 = sadd.s32 4294967295, %s1609_s15   ;;  %s1143_s17 = sadd.s32 4294967294, %s1609_s15   ;;  %s1609_s15 = sphi %s1640_s15, %s1977_s15   ;;  %s1605_s14 = sphi %s1638_s14, %s1976_s14   ;;  %s1601_s13 = sphi %s1636_s13, %s1975_s13   ;;  %s1597_s12 = sphi %s1634_s12, %s1974_s12  }
   0x4   : > { %s1659_s18 = sadd.s32 1, %s1609_s15   ;;  %s91_s19 = sadd.s32 1, %s1605_s14 }
   0x5   : > { %s88_s20 = ssub.s32 %s1609_s15, %s1659_s18  ;;  %p101_p0 = scmp.ne.s32.totalorder %s1605_s14, %s1601_s13 }
   0x6   : > { %p89_p1 = scmp.eq.s32.totalorder %s88_s20, 0  ;;  %p102_p2 = scmp.eq.s32.totalorder %s1655_s16, 3 }
   0x7   : > { %p107_p3 = scmp.ne.s32.totalorder %s1601_s13, %s1597_s12  ;;  %p108_p4 = scmp.eq.s32.totalorder %s1143_s17, 3 }
   0x8   : > { %s1670_s21 = scalar_select %p89_p1, %s1605_s14, %s91_s19  }
   0x9   : > { %p1672_p5 = por %p102_p2, %p101_p0  ;;  %p1676_p6 = por %p108_p4, %p107_p3 }
   0xa   : > { %p1146_p7 = scmp.ge.s32.totalorder %s1609_s15, 1  ;;  %p142_p8 = scmp.lt.s32.totalorder %s1609_s15, 5 }
   0xc   : > { %p143_p9 = pnand %p1146_p7, %p142_p8 }
   0xd   : > { %v1455_v0 = vld [vmem:[%s1969_s1 + $0x40] sm:$0xff] (!%p143_p9)   ;;  %v1459_v4 = vld [vmem:[%s1969_s1 + $0x48] sm:$0xff] (!%p143_p9)   ;;  %v1463_v8 = vld [vmem:[%s1969_s1 + $0x50] sm:$0xff] (!%p143_p9)   ;;  %s1148_s9 = sshll.u32 (!%p143_p9), %s1655_s16, 4  ;;  %vm719_vm0 = vcmask (!%p143_p9), 523264   ;;  %s164_s5 = sand.u32 (!%p143_p9), 1, %s1601_s13  }
   0xe   : > { %146 = sbr.rel (%p143_p9) target bundleno = 354 (0x162), region = 32  ;;  %v1456_v1 = vld [vmem:[%s1969_s1 + $0xc0] sm:$0xff] (!%p143_p9)   ;;  %1241 = vmatprep.subr.bf16.mxu0 (!%p143_p9), %v1455_v0  ;;  %v1460_v5 = vld [vmem:[%s1969_s1 + $0xc8] sm:$0xff] (!%p143_p9)   ;;  %v1464_v9 = vld [vmem:[%s1969_s1 + $0xd0] sm:$0xff] (!%p143_p9)   ;;  %p168_p10 = scmp.lt.s32.totalorder (!%p143_p9), %s1148_s9, 63 }
   0xf   : > { %v1457_v2 = vld [vmem:[%s1969_s1] sm:$0xff] (!%p143_p9)   ;;  %1305 = vmatprep.subr.bf16.mxu1 (!%p143_p9), %v1456_v1  ;;  %v1461_v6 = vld [vmem:[%s1969_s1 + $0x8] sm:$0xff] (!%p143_p9)   ;;  %v1465_v10 = vld [vmem:[%s1969_s1 + $0x10] sm:$0xff] (!%p143_p9)   ;;  %s1927_s17 = scalar_lea.sflag (!%p143_p9), [#allocation3], %s164_s5  ;;  %s1611_s20 = smov (!%p143_p9), [#allocation2]  }
  0x10   : > { %v1458_v3 = vld [vmem:[%s1969_s1 + $0x80] sm:$0xff] (!%p143_p9)   ;;  %1242 = vmatpush3.bf16.msra.mxu0 (!%p143_p9), %v1457_v2  ;;  %v1462_v7 = vld [vmem:[%s1969_s1 + $0x88] sm:$0xff] (!%p143_p9)   ;;  %v1466_v11 = vld [vmem:[%s1969_s1 + $0x90] sm:$0xff] (!%p143_p9)  }
  0x11   : > { %1306 = vmatpush3.bf16.msra.mxu1 (!%p143_p9), %v1458_v3  ;;  %1243 = vmatprep.subr.bf16.mxu0 (!%p143_p9), %v1459_v4  ;;  %v1467_v12 = vld [vmem:[%s1969_s1 + $0x58] sm:$0xff] (!%p143_p9)   ;;  %v1471_v16 = vld [vmem:[%s1969_s1 + $0x60] sm:$0xff] (!%p143_p9)   ;;  %v1475_v20 = vld [vmem:[%s1969_s1 + $0x68] sm:$0xff] (!%p143_p9)  }
  0x12   : > { %1307 = vmatprep.subr.bf16.mxu1 (!%p143_p9), %v1460_v5  ;;  %v1468_v13 = vld [vmem:[%s1969_s1 + $0xd8] sm:$0xff] (!%p143_p9)   ;;  %v1472_v17 = vld [vmem:[%s1969_s1 + $0xe0] sm:$0xff] (!%p143_p9)   ;;  %v1476_v21 = vld [vmem:[%s1969_s1 + $0xe8] sm:$0xff] (!%p143_p9)  }
  0x13   : > { %v1469_v14 = vld [vmem:[%s1969_s1 + $0x18] sm:$0xff] (!%p143_p9)   ;;  %v1473_v18 = vld [vmem:[%s1969_s1 + $0x20] sm:$0xff] (!%p143_p9)   ;;  %v1477_v22 = vld [vmem:[%s1969_s1 + $0x28] sm:$0xff] (!%p143_p9)  }
  0x14   : > { %1244 = vmatpush3.bf16.msra.mxu0 (!%p143_p9), %v1461_v6  ;;  %v1470_v15 = vld [vmem:[%s1969_s1 + $0x98] sm:$0xff] (!%p143_p9)   ;;  %v1474_v19 = vld [vmem:[%s1969_s1 + $0xa0] sm:$0xff] (!%p143_p9)   ;;  %v1478_v23 = vld [vmem:[%s1969_s1 + $0xa8] sm:$0xff] (!%p143_p9)  }
  0x15   : > { %1308 = vmatpush3.bf16.msra.mxu1 %v1462_v7  ;;  %1245 = vmatprep.subr.bf16.mxu0 %v1463_v8  ;;  %s1979_s9 = smov (!%p168_p10, %s1148_s9), 63  ;;  %v1479_v24 = vld [vmem:[%s1969_s1 + $0x70] sm:$0xff]   ;;  %v1483_v28 = vld [vmem:[%s1969_s1 + $0x78] sm:$0xff]   ;;  %v1493_v36 = vld [vmem:[%s1969_s1 + $0x100] sm:$0xff]  }
  0x16   : > { %1309 = vmatprep.subr.bf16.mxu1 %v1464_v9  ;;  %v1480_v25 = vld [vmem:[%s1969_s1 + $0xf0] sm:$0xff]   ;;  %s1413_s24 = smul.u32 20, %s1979_s9  ;;  %v1484_v29 = vld [vmem:[%s1969_s1 + $0xf8] sm:$0xff]   ;;  %v1506_v42 = vld [vmem:[%s1969_s1 + $0x108] sm:$0xff]   ;;  %s1147_s9 = sshll.u32 %s164_s5, 7 }
  0x17   : > { %v1481_v26 = vld [vmem:[%s1969_s1 + $0x30] sm:$0xff]   ;;  %v1485_v30 = vld [vmem:[%s1969_s1 + $0x38] sm:$0xff]   ;;  %s1892_s6 = scalar_lea.vmem [#allocation2], %s1147_s9 }
  0x18   : > { %1246 = vmatpush3.bf16.msra.mxu0 %v1465_v10  ;;  %v1482_v27 = vld [vmem:[%s1969_s1 + $0xb0] sm:$0xff]   ;;  %s1776_s7 = scalar_lea.vmem %s1968_s0, %s1413_s24  ;;  %v1486_v31 = vld [vmem:[%s1969_s1 + $0xb8] sm:$0xff]   ;;  %s1081_s8 = sshll.u32 %s1892_s6, 4  ;;  %s1918_s8 = int_to_ptr.vmem [resolvable:$true] %s1081_s8 }
  0x19   : > { %1310 = vmatpush3.bf16.msra.mxu1 %v1466_v11  ;;  %1247 = vmatprep.subr.bf16.mxu0 %v1467_v12  ;;  %v1487_v32 = vld [vmem:[%s1776_s7] ss:$20 sps:$4 sm:$0xff]   ;;  %v1489_v33 = vld [vmem:[%s1776_s7 + $0x4] ss:$20 sps:$4 sm:$0xff]   ;;  %v1490_v34 = vld [vmem:[%s1776_s7 + $0x8] ss:$20 sps:$4 sm:$0xff]  }
  0x1a   : > { %1311 = vmatprep.subr.bf16.mxu1 %v1468_v13  ;;  %v1492_v35 = vld [vmem:[%s1776_s7 + $0xc] ss:$20 sps:$4 sm:$0xff]   ;;  %776 = vmatprep.mubr.bf16.mxu0 %v1489_v33  ;;  %v1496_v38 = vld [vmem:[%s1776_s7 + $0x34] ss:$20 sps:$4 sm:$0xff]   ;;  %v1499_v40 = vld [vmem:[%s1776_s7 + $0x30] ss:$20 sps:$4 sm:$0xff]  }
  0x1b   : > { %873 = vmatprep.mubr.bf16.mxu1 %v1492_v35  ;;  %v1494_v37 = vld [vmem:[%s1776_s7 + $0x2c] ss:$20 sps:$4 sm:$0xff]   ;;  %v1498_v39 = vld [vmem:[%s1776_s7 + $0x28] ss:$20 sps:$4 sm:$0xff]   ;;  %v1504_v44 = vld [vmem:[%s1776_s7 + $0x50] ss:$20 sps:$4 sm:$0xff]  }
  0x1c   : > { %1248 = vmatpush3.bf16.msra.mxu0 %v1469_v14  ;;  %v1500_v41 = vld [vmem:[%s1776_s7 + $0x54] ss:$20 sps:$4 sm:$0xff]   ;;  %v1502_v43 = vld [vmem:[%s1776_s7 + $0x5c] ss:$20 sps:$4 sm:$0xff]   ;;  %v1505_v45 = vld [vmem:[%s1776_s7 + $0x58] ss:$20 sps:$4 sm:$0xff]  }
  0x1d   : > { %1312 = vmatpush3.bf16.msra.mxu1 %v1470_v15  ;;  %1249 = vmatprep.subr.bf16.mxu0 %v1471_v16  ;;  %v1519_v46 = vld [vmem:[%s1969_s1 + $0x110] sm:$0xff]   ;;  %v1509_v48 = vld [vmem:[%s1776_s7 + $0x84] ss:$20 sps:$4 sm:$0xff]   ;;  %v1515_v53 = vld [vmem:[%s1776_s7 + $0xac] ss:$20 sps:$4 sm:$0xff]   ;;  %s1547_s19 = scalar_lea.vmem %s1918_s8, 2048 }
  0x1e   : > { %1313 = vmatprep.subr.bf16.mxu1 %v1472_v17  ;;  %v1507_v47 = vld [vmem:[%s1776_s7 + $0x7c] ss:$20 sps:$4 sm:$0xff]   ;;  %v1511_v50 = vld [vmem:[%s1776_s7 + $0x78] ss:$20 sps:$4 sm:$0xff]   ;;  %v1512_v51 = vld [vmem:[%s1776_s7 + $0x80] ss:$20 sps:$4 sm:$0xff]   ;;  %p1548_p11 = scmp.ne.s32.totalorder %s1918_s8, %s1547_s19 }
  0x1f   : > { %v1532_v49 = vld [vmem:[%s1969_s1 + $0x118] sm:$0xff]   ;;  %v1517_v54 = vld [vmem:[%s1776_s7 + $0xa0] ss:$20 sps:$4 sm:$0xff]   ;;  %v1525_v59 = vld [vmem:[%s1776_s7 + $0xd0] ss:$20 sps:$4 sm:$0xff]   ;;  %s1551_s24 = sshll.u32 %s1611_s20, 4  ;;  %s1552_s24 = int_to_ptr.vmem [resolvable:$false] %s1551_s24 }
  0x20   : > { %1250 = vmatpush3.bf16.msra.mxu0 %v1473_v18  ;;  %v1513_v52 = vld [vmem:[%s1776_s7 + $0xa4] ss:$20 sps:$4 sm:$0xff]   ;;  %v1518_v55 = vld [vmem:[%s1776_s7 + $0xa8] ss:$20 sps:$4 sm:$0xff]   ;;  %v1520_v56 = vld [vmem:[%s1776_s7 + $0xcc] ss:$20 sps:$4 sm:$0xff]   ;;  %p1549_p12 = pnand %p1548_p11, %p1672_p5  ;;  %p1554_p0 = scmp.lt.s32.totalorder %s1918_s8, %s1552_s24 }
  0x21   : > { %1314 = vmatpush3.bf16.msra.mxu1 %v1474_v19  ;;  %1251 = vmatprep.subr.bf16.mxu0 %v1475_v20  ;;  %v1522_v57 = vld [vmem:[%s1776_s7 + $0xd4] ss:$20 sps:$4 sm:$0xff]   ;;  %v1528_v61 = vld [vmem:[%s1776_s7 + $0xfc] ss:$20 sps:$4 sm:$0xff]   ;;  %v1531_v63 = vld [vmem:[%s1776_s7 + $0xf8] ss:$20 sps:$4 sm:$0xff]  }
  0x22   : > { %1315 = vmatprep.subr.bf16.mxu1 %v1476_v21  ;;  %v1524_v58 = vld [vmem:[%s1776_s7 + $0xc8] ss:$20 sps:$4 sm:$0xff]   ;;  %v1530_v62 = vld [vmem:[%s1776_s7 + $0xf0] ss:$20 sps:$4 sm:$0xff]   ;;  %v1537_v2 = vld [vmem:[%s1776_s7 + $0x118] ss:$20 sps:$4 sm:$0xff]   ;;  %p1550_p13 = pneg %p1549_p12 }
  0x23   : > { %v1526_v60 = vld [vmem:[%s1776_s7 + $0xf4] ss:$20 sps:$4 sm:$0xff]   ;;  %v1533_v0 = vld [vmem:[%s1776_s7 + $0x11c] ss:$20 sps:$4 sm:$0xff]   ;;  %v1535_v1 = vld [vmem:[%s1776_s7 + $0x124] ss:$20 sps:$4 sm:$0xff]  }
  0x24   : > { %1252 = vmatpush3.bf16.msra.mxu0 %v1477_v22  ;;  %v1538_v3 = vld [vmem:[%s1776_s7 + $0x120] ss:$20 sps:$4 sm:$0xff]   ;;  %v1539_v4 = vld [vmem:[%s1776_s7 + $0x10] ss:$20 sps:$4 sm:$0xff]   ;;  %v1541_v6 = vld [vmem:[%s1776_s7 + $0x38] ss:$20 sps:$4 sm:$0xff]  }
  0x25   : > { %1316 = vmatpush3.bf16.msra.mxu1 %v1478_v23  ;;  %1253 = vmatprep.subr.bf16.mxu0 %v1479_v24  ;;  %v1540_v5 = vld [vmem:[%s1776_s7 + $0xb0] ss:$20 sps:$4 sm:$0xff]   ;;  %v1542_v7 = vld [vmem:[%s1776_s7 + $0xd8] ss:$20 sps:$4 sm:$0xff]   ;;  %v1543_v8 = vld [vmem:[%s1776_s7 + $0x60] ss:$20 sps:$4 sm:$0xff]  }
  0x26   : > { %1317 = vmatprep.subr.bf16.mxu1 %v1480_v25  ;;  %v1544_v9 = vld [vmem:[%s1776_s7 + $0x100] ss:$20 sps:$4 sm:$0xff]   ;;  %v1545_v10 = vld [vmem:[%s1776_s7 + $0x88] ss:$20 sps:$4 sm:$0xff]   ;;  %s1553_s25 = scalar_lea.vmem %s1552_s24, 4096 }
  0x27   : > { %v1546_v11 = vld [vmem:[%s1776_s7 + $0x128] ss:$20 sps:$4 sm:$0xff]   ;;  %v1847_v14 = vld [vmem:[%s1970_s2] ss:$0 sm:$0xff]  ;;  %s1240_s7 = sshll.u32 %s1655_s16, 11  ;;  %p1555_p1 = scmp.lt.s32.totalorder %s1553_s25, %s1547_s19 }
  0x28   : > { %1254 = vmatpush3.bf16.msra.mxu0 %v1481_v26  ;;  %s1916_s11 = scalar_lea.hbm %s1971_s3, %s1240_s7 }
  0x29   : > { %1318 = vmatpush3.bf16.msra.mxu1 %v1482_v27  ;;  %1255 = vmatprep.subr.bf16.mxu0 %v1483_v28  ;;  %p1556_p2 = por %p1555_p1, %p1554_p0 }
  0x2a   : > { %1319 = vmatprep.subr.bf16.mxu1 %v1484_v29 }
  0x2b   : > { %p1557_p3 = pnand %p1556_p2, %p1550_p13 }
  0x2c   : > { %1256 = vmatpush3.bf16.msra.mxu0 %v1485_v30 }
  0x2d   : > { %1320 = vmatpush3.bf16.msra.mxu1 %v1486_v31  ;;  %1381 = vmatprep.subr.bf16.mxu0 %v1493_v36 }
  0x2e   : > { %1405 = vmatprep.subr.bf16.mxu1 %v1493_v36 }
  0x2f   : > { %777 = vmatmul.mubr.bf16.vlgmr.msra.gmra.mrb[0].mxu0 %v1487_v32 }
  0x30   : > { %874 = vmatmul.mubr.bf16.vlgmr.msra.gmra.mrb[0].mxu1 %v1490_v34  ;;  %1382 = vmatpush3.bf16.msra.mxu0 %v1493_v36 }
  0x31   : > { %1409 = vmatpush3.bf16.msra.mxu1 %v1493_v36  ;;  %784 = vmatprep.mubr.bf16.mxu0 %v1494_v37 }
  0x32   : > { %881 = vmatprep.mubr.bf16.mxu1 %v1496_v38  ;;  %1383 = vmatprep.subr.bf16.mxu0 %v1506_v42 }
  0x33   : > { %1406 = vmatprep.subr.bf16.mxu1 %v1506_v42 }
  0x34   : > { %1384 = vmatpush3.bf16.msra.mxu0 %v1506_v42 }
  0x35   : > { %1410 = vmatpush3.bf16.msra.mxu1 %v1506_v42  ;;  %1385 = vmatprep.subr.bf16.mxu0 %v1519_v46 }
  0x36   : > { %1407 = vmatprep.subr.bf16.mxu1 %v1519_v46 }
  0x37   : > { %785 = vmatmul.mubr.bf16.gmra.mrb[4].mxu0 %v1498_v39 }
  0x38   : > { %882 = vmatmul.mubr.bf16.gmra.mrb[4].mxu1 %v1499_v40  ;;  %792 = vmatprep.mubr.bf16.mxu0 %v1500_v41 }
  0x39   : > { %889 = vmatprep.mubr.bf16.mxu1 %v1502_v43  ;;  %1386 = vmatpush3.bf16.msra.mxu0 %v1519_v46 }
  0x3a   : > { %1411 = vmatpush3.bf16.msra.mxu1 %v1519_v46  ;;  %1387 = vmatprep.subr.bf16.mxu0 %v1532_v49 }
  0x3b   : > { %1408 = vmatprep.subr.bf16.mxu1 %v1532_v49 }
  0x3d   : > { %1388 = vmatpush3.bf16.msra.mxu0 %v1532_v49 }
  0x3e   : > { %1412 = vmatpush3.bf16.msra.mxu1 %v1532_v49 }
  0x3f   : > { %793 = vmatmul.mubr.bf16.gmra.mrb[8].mxu0 %v1504_v44 }
  0x40   : > { %890 = vmatmul.mubr.bf16.gmra.mrb[8].mxu1 %v1505_v45  ;;  %800 = vmatprep.mubr.bf16.mxu0 %v1507_v47 }
  0x41   : > { %897 = vmatprep.mubr.bf16.mxu1 %v1509_v48 }
  0x47   : > { %801 = vmatmul.mubr.bf16.gmra.mrb[12].mxu0 %v1511_v50 }
  0x48   : > { %898 = vmatmul.mubr.bf16.gmra.mrb[12].mxu1 %v1512_v51  ;;  %808 = vmatprep.mubr.bf16.mxu0 %v1513_v52 }
  0x49   : > { %905 = vmatprep.mubr.bf16.mxu1 %v1515_v53 }
  0x4f   : > { %809 = vmatmul.mubr.bf16.gmra.mrb[16].mxu0 %v1517_v54 }
  0x50   : > { %906 = vmatmul.mubr.bf16.gmra.mrb[16].mxu1 %v1518_v55  ;;  %816 = vmatprep.mubr.bf16.mxu0 %v1520_v56 }
  0x51   : > { %913 = vmatprep.mubr.bf16.mxu1 %v1522_v57 }
  0x57   : > { %817 = vmatmul.mubr.bf16.gmra.mrb[20].mxu0 %v1524_v58 }
  0x58   : > { %914 = vmatmul.mubr.bf16.gmra.mrb[20].mxu1 %v1525_v59  ;;  %824 = vmatprep.mubr.bf16.mxu0 %v1526_v60 }
  0x59   : > { %921 = vmatprep.mubr.bf16.mxu1 %v1528_v61 }
  0x5f   : > { %825 = vmatmul.mubr.bf16.gmra.mrb[24].mxu0 %v1530_v62 }
  0x60   : > { %922 = vmatmul.mubr.bf16.gmra.mrb[24].mxu1 %v1531_v63  ;;  %832 = vmatprep.mubr.bf16.mxu0 %v1533_v0 }
  0x61   : > { %929 = vmatprep.mubr.bf16.mxu1 %v1535_v1 }
  0x67   : > { %833 = vmatmul.mubr.bf16.gmra.mrb[28].mxu0 %v1537_v2 }
  0x68   : > { %930 = vmatmul.mubr.bf16.gmra.mrb[28].mxu1 %v1538_v3  ;;  %1389 = vmatprep.mubr.msk.bf16.mxu0 %vm719_vm0, %v1539_v4 }
  0x69   : > { %1397 = vmatprep.mubr.msk.bf16.mxu1 %vm719_vm0, %v1540_v5 }
  0x6f   : > { %1390 = vmatmul.mubr.msk.bf16.vlgmr.msra.gmra.mrb[32].mxu0 %vm719_vm0, %v1541_v6 }
  0x70   : > { %1398 = vmatmul.mubr.msk.bf16.vlgmr.msra.gmra.mrb[32].mxu1 %vm719_vm0, %v1542_v7  ;;  %1393 = vmatprep.mubr.msk.bf16.mxu0 %vm719_vm0, %v1543_v8 }
  0x71   : > { %1401 = vmatprep.mubr.msk.bf16.mxu1 %vm719_vm0, %v1544_v9 }
  0x77   : > { %1394 = vmatmul.mubr.msk.bf16.gmra.mrb[36].mxu0 %vm719_vm0, %v1545_v10 }
  0x78   : > { %1402 = vmatmul.mubr.msk.bf16.gmra.mrb[36].mxu1 %vm719_vm0, %v1546_v11 }
 0x102   : > { %v1257_v12 = vpop.f32.mrb[0].mxu0 }
 0x103   : > { %v1321_v13 = vpop.f32.mrb[0].mxu1  ;;  %v1258_v15 = vpop.f32.mrb[1].mxu0 }
 0x104   : > { %v1259_v16 = vadd.f32 %v1258_v15, %v1257_v12  ;;  %v1322_v17 = vpop.f32.mrb[1].mxu1  ;;  %v1260_v18 = vpop.f32.mrb[2].mxu0 }
 0x105   : > { %v1323_v19 = vadd.f32 %v1322_v17, %v1321_v13  ;;  %v1324_v20 = vpop.f32.mrb[2].mxu1  ;;  %v1261_v21 = vpop.f32.mrb[3].mxu0 }
 0x106   : > { %v779_v22 = vadd.f32 %v1259_v16, %v1847_v14  ;;  %v1262_v23 = vadd.f32 %v1261_v21, %v1260_v18  ;;  %v1325_v24 = vpop.f32.mrb[3].mxu1 }
 0x107   : > { %v1326_v25 = vadd.f32 %v1325_v24, %v1324_v20 }
 0x108   : > { %v782_v26 = vadd.f32 %v1262_v23, %v1847_v14  ;;  %v1851_v27 = vadd.f32 %v1323_v19, %v779_v22 }
 0x10a   : > { %v1263_v28 = vpop.f32.mrb[4].mxu0  ;;  %v1853_v29 = vadd.f32 %v1326_v25, %v782_v26 }
 0x10b   : > { %v1327_v30 = vpop.f32.mrb[4].mxu1  ;;  %v1264_v31 = vpop.f32.mrb[5].mxu0 }
 0x10c   : > { %v1265_v32 = vadd.f32 %v1264_v31, %v1263_v28  ;;  %v1328_v33 = vpop.f32.mrb[5].mxu1  ;;  %v1266_v34 = vpop.f32.mrb[6].mxu0 }
 0x10d   : > { %v1329_v35 = vadd.f32 %v1328_v33, %v1327_v30  ;;  %v1330_v36 = vpop.f32.mrb[6].mxu1  ;;  %v1267_v37 = vpop.f32.mrb[7].mxu0 }
 0x10e   : > { %v787_v38 = vadd.f32 %v1265_v32, %v1847_v14  ;;  %v1268_v39 = vadd.f32 %v1267_v37, %v1266_v34  ;;  %v1331_v40 = vpop.f32.mrb[7].mxu1 }
 0x10f   : > { %v1332_v41 = vadd.f32 %v1331_v40, %v1330_v36 }
 0x110   : > { %v790_v42 = vadd.f32 %v1268_v39, %v1847_v14  ;;  %v1857_v43 = vadd.f32 %v1329_v35, %v787_v38 }
 0x112   : > { %v1269_v44 = vpop.f32.mrb[8].mxu0  ;;  %v1859_v45 = vadd.f32 %v1332_v41, %v790_v42 }
 0x113   : > { %v1333_v46 = vpop.f32.mrb[8].mxu1  ;;  %v1270_v47 = vpop.f32.mrb[9].mxu0 }
 0x114   : > { %v1271_v48 = vadd.f32 %v1270_v47, %v1269_v44  ;;  %v1334_v49 = vpop.f32.mrb[9].mxu1  ;;  %v1272_v50 = vpop.f32.mrb[10].mxu0 }
 0x115   : > { %v1335_v51 = vadd.f32 %v1334_v49, %v1333_v46  ;;  %v1336_v52 = vpop.f32.mrb[10].mxu1  ;;  %v1273_v53 = vpop.f32.mrb[11].mxu0 }
 0x116   : > { %v795_v54 = vadd.f32 %v1271_v48, %v1847_v14  ;;  %v1274_v55 = vadd.f32 %v1273_v53, %v1272_v50  ;;  %v1337_v56 = vpop.f32.mrb[11].mxu1 }
 0x117   : > { %v1338_v57 = vadd.f32 %v1337_v56, %v1336_v52 }
 0x118   : > { %v798_v58 = vadd.f32 %v1274_v55, %v1847_v14  ;;  %v1863_v59 = vadd.f32 %v1335_v51, %v795_v54 }
 0x11a   : > { %v1275_v60 = vpop.f32.mrb[12].mxu0  ;;  %v1865_v61 = vadd.f32 %v1338_v57, %v798_v58 }
 0x11b   : > { %v1339_v62 = vpop.f32.mrb[12].mxu1  ;;  %v1276_v63 = vpop.f32.mrb[13].mxu0 }
 0x11c   : > { %v1277_v0 = vadd.f32 %v1276_v63, %v1275_v60  ;;  %v1340_v1 = vpop.f32.mrb[13].mxu1  ;;  %v1278_v2 = vpop.f32.mrb[14].mxu0 }
 0x11d   : > { %v1341_v3 = vadd.f32 %v1340_v1, %v1339_v62  ;;  %v1342_v4 = vpop.f32.mrb[14].mxu1  ;;  %v1279_v5 = vpop.f32.mrb[15].mxu0 }
 0x11e   : > { %v803_v6 = vadd.f32 %v1277_v0, %v1847_v14  ;;  %v1280_v7 = vadd.f32 %v1279_v5, %v1278_v2  ;;  %v1343_v8 = vpop.f32.mrb[15].mxu1 }
 0x11f   : > { %v1344_v9 = vadd.f32 %v1343_v8, %v1342_v4 }
 0x120   : > { %v806_v10 = vadd.f32 %v1280_v7, %v1847_v14  ;;  %v1869_v11 = vadd.f32 %v1341_v3, %v803_v6 }
 0x122   : > { %v1281_v12 = vpop.f32.mrb[16].mxu0  ;;  %v1871_v13 = vadd.f32 %v1344_v9, %v806_v10 }
 0x123   : > { %v1345_v15 = vpop.f32.mrb[16].mxu1  ;;  %v1282_v16 = vpop.f32.mrb[17].mxu0 }
 0x124   : > { %v1283_v17 = vadd.f32 %v1282_v16, %v1281_v12  ;;  %v1346_v18 = vpop.f32.mrb[17].mxu1  ;;  %v1284_v19 = vpop.f32.mrb[18].mxu0 }
 0x125   : > { %v1347_v20 = vadd.f32 %v1346_v18, %v1345_v15  ;;  %v1348_v21 = vpop.f32.mrb[18].mxu1  ;;  %v1285_v22 = vpop.f32.mrb[19].mxu0 }
 0x126   : > { %v811_v23 = vadd.f32 %v1283_v17, %v1847_v14  ;;  %v1286_v24 = vadd.f32 %v1285_v22, %v1284_v19  ;;  %v1349_v25 = vpop.f32.mrb[19].mxu1 }
 0x127   : > { %v1350_v26 = vadd.f32 %v1349_v25, %v1348_v21 }
 0x128   : > { %v814_v28 = vadd.f32 %v1286_v24, %v1847_v14  ;;  %v908_v30 = vadd.f32 %v1347_v20, %v811_v23 }
 0x12a   : > { %v1287_v31 = vpop.f32.mrb[20].mxu0  ;;  %v1875_v32 = vadd.f32 %v1350_v26, %v814_v28 }
 0x12b   : > { %v1351_v33 = vpop.f32.mrb[20].mxu1  ;;  %v1288_v34 = vpop.f32.mrb[21].mxu0 }
 0x12c   : > { %v1289_v35 = vadd.f32 %v1288_v34, %v1287_v31  ;;  %v1352_v36 = vpop.f32.mrb[21].mxu1  ;;  %v1290_v37 = vpop.f32.mrb[22].mxu0 }
 0x12d   : > { %v1353_v38 = vadd.f32 %v1352_v36, %v1351_v33  ;;  %v1354_v39 = vpop.f32.mrb[22].mxu1  ;;  %v1291_v40 = vpop.f32.mrb[23].mxu0 }
 0x12e   : > { %v819_v41 = vadd.f32 %v1289_v35, %v1847_v14  ;;  %v1292_v42 = vadd.f32 %v1291_v40, %v1290_v37  ;;  %v1355_v44 = vpop.f32.mrb[23].mxu1 }
 0x12f   : > { %v1356_v46 = vadd.f32 %v1355_v44, %v1354_v39 }
 0x130   : > { %v822_v47 = vadd.f32 %v1292_v42, %v1847_v14  ;;  %v916_v48 = vadd.f32 %v1353_v38, %v819_v41 }
 0x132   : > { %v1293_v49 = vpop.f32.mrb[24].mxu0  ;;  %v919_v50 = vadd.f32 %v1356_v46, %v822_v47 }
 0x133   : > { %v1357_v51 = vpop.f32.mrb[24].mxu1  ;;  %v1294_v52 = vpop.f32.mrb[25].mxu0 }
 0x134   : > { %v1295_v53 = vadd.f32 %v1294_v52, %v1293_v49  ;;  %v1358_v54 = vpop.f32.mrb[25].mxu1  ;;  %v1296_v55 = vpop.f32.mrb[26].mxu0 }
 0x135   : > { %v1359_v56 = vadd.f32 %v1358_v54, %v1357_v51  ;;  %v1360_v57 = vpop.f32.mrb[26].mxu1  ;;  %v1297_v58 = vpop.f32.mrb[27].mxu0 }
 0x136   : > { %v827_v60 = vadd.f32 %v1295_v53, %v1847_v14  ;;  %v1298_v62 = vadd.f32 %v1297_v58, %v1296_v55  ;;  %v1361_v63 = vpop.f32.mrb[27].mxu1 }
 0x137   : > { %v1362_v0 = vadd.f32 %v1361_v63, %v1360_v57 }
 0x138   : > { %v830_v1 = vadd.f32 %v1298_v62, %v1847_v14  ;;  %v924_v2 = vadd.f32 %v1359_v56, %v827_v60 }
 0x13a   : > { %v1299_v3 = vpop.f32.mrb[28].mxu0  ;;  %v1881_v4 = vadd.f32 %v1362_v0, %v830_v1 }
 0x13b   : > { %v1363_v5 = vpop.f32.mrb[28].mxu1  ;;  %v1300_v6 = vpop.f32.mrb[29].mxu0 }
 0x13c   : > { %v1301_v7 = vadd.f32 %v1300_v6, %v1299_v3  ;;  %v1364_v8 = vpop.f32.mrb[29].mxu1  ;;  %v1302_v9 = vpop.f32.mrb[30].mxu0 }
 0x13d   : > { %v1365_v10 = vadd.f32 %v1364_v8, %v1363_v5  ;;  %v1366_v12 = vpop.f32.mrb[30].mxu1  ;;  %v1303_v15 = vpop.f32.mrb[31].mxu0 }
 0x13e   : > { %v835_v16 = vadd.f32 %v1301_v7, %v1847_v14  ;;  %v1304_v17 = vadd.f32 %v1303_v15, %v1302_v9  ;;  %v1367_v18 = vpop.f32.mrb[31].mxu1 }
 0x13f   : > { %v1368_v19 = vadd.f32 %v1367_v18, %v1366_v12 }
 0x140   : > { %v838_v20 = vadd.f32 %v1304_v17, %v1847_v14  ;;  %v932_v21 = vadd.f32 %v1365_v10, %v835_v16 }
 0x142   : > { %v1391_v22 = vpop.f32.mrb[32].mxu0  ;;  %v935_v23 = vadd.f32 %v1368_v19, %v838_v20 }
 0x143   : > { %v981_v24 = vadd.f32 %v1391_v22, %v1857_v43  ;;  %v1399_v25 = vpop.f32.mrb[32].mxu1  ;;  %v972_v26 = vpop.f32.mrb[33].mxu0 }
 0x144   : > { %v1013_v28 = vadd.f32 %v1399_v25, %v916_v48  ;;  %v973_v31 = vadd.f32 %v972_v26, %v1851_v27  ;;  %v1004_v33 = vpop.f32.mrb[33].mxu1  ;;  %v1392_v34 = vpop.f32.mrb[34].mxu0 }
 0x145   : > { %v1037_v35 = vmax.f32 %v981_v24, 0.0  ;;  %v1005_v36 = vadd.f32 %v1004_v33, %v908_v30  ;;  %v984_v37 = vadd.f32 %v1392_v34, %v1859_v45  ;;  %v1400_v38 = vpop.f32.mrb[34].mxu1  ;;  %v975_v14 = vpop.f32.mrb[35].mxu0 }
 0x146   : > { %v1045_v39 = vmax.f32 %v1013_v28, 0.0  ;;  %v1035_v40 = vmax.f32 %v973_v31, 0.0  ;;  %v1016_v41 = vadd.f32 %v1400_v38, %v919_v50  ;;  %v976_v42 = vadd.f32 %v975_v14, %v1853_v29  ;;  %v1007_v44 = vpop.f32.mrb[35].mxu1 }
 0x147   : > { %1053 = vst [vmem:[%s1892_s6 + $0x10] sm:$0xff] %v1037_v35  ;;  %v1043_v27 = vmax.f32 %v1005_v36, 0.0  ;;  %v1038_v43 = vmax.f32 %v984_v37, 0.0  ;;  %v1008_v45 = vadd.f32 %v1007_v44, %v1875_v32 }
 0x148   : > { %1061 = vst [vmem:[%s1892_s6 + $0x50] sm:$0xff] %v1045_v39  ;;  %1051 = vst [vmem:[%s1892_s6] sm:$0xff] %v1035_v40  ;;  %v1046_v30 = vmax.f32 %v1016_v41, 0.0  ;;  %v1036_v29 = vmax.f32 %v976_v42, 0.0 }
 0x149   : > { %1059 = vst [vmem:[%s1892_s6 + $0x40] sm:$0xff] %v1043_v27  ;;  %1054 = vst [vmem:[%s1892_s6 + $0x18] sm:$0xff] %v1038_v43  ;;  %v1044_v46 = vmax.f32 %v1008_v45, 0.0 }
 0x14a   : > { %1062 = vst [vmem:[%s1892_s6 + $0x58] sm:$0xff] %v1046_v30  ;;  %1052 = vst [vmem:[%s1892_s6 + $0x8] sm:$0xff] %v1036_v29  ;;  %v1395_v47 = vpop.f32.mrb[36].mxu0 }
 0x14b   : > { %1060 = vst [vmem:[%s1892_s6 + $0x48] sm:$0xff] %v1044_v46  ;;  %v997_v48 = vadd.f32 %v1395_v47, %v1869_v11  ;;  %v1403_v49 = vpop.f32.mrb[36].mxu1  ;;  %v988_v50 = vpop.f32.mrb[37].mxu0 }
 0x14c   : > { %v1029_v51 = vadd.f32 %v1403_v49, %v932_v21  ;;  %v989_v32 = vadd.f32 %v988_v50, %v1863_v59  ;;  %v1020_v52 = vpop.f32.mrb[37].mxu1  ;;  %v1396_v53 = vpop.f32.mrb[38].mxu0 }
 0x14d   : > { %v1041_v54 = vmax.f32 %v997_v48, 0.0  ;;  %v1021_v55 = vadd.f32 %v1020_v52, %v924_v2  ;;  %v1000_v56 = vadd.f32 %v1396_v53, %v1871_v13  ;;  %v1404_v57 = vpop.f32.mrb[38].mxu1  ;;  %v991_v58 = vpop.f32.mrb[39].mxu0 }
 0x14e   : > { %v1049_v11 = vmax.f32 %v1029_v51, 0.0  ;;  %v1039_v60 = vmax.f32 %v989_v32, 0.0  ;;  %v1032_v62 = vadd.f32 %v1404_v57, %v935_v23  ;;  %v992_v59 = vadd.f32 %v991_v58, %v1865_v61  ;;  %v1023_v63 = vpop.f32.mrb[39].mxu1 }
 0x14f   : > { %1057 = vst [vmem:[%s1892_s6 + $0x30] sm:$0xff] %v1041_v54  ;;  %v1047_v0 = vmax.f32 %v1021_v55, 0.0  ;;  %v1042_v1 = vmax.f32 %v1000_v56, 0.0  ;;  %v1024_v13 = vadd.f32 %v1023_v63, %v1881_v4 }
 0x150   : > { %1065 = vst [vmem:[%s1892_s6 + $0x70] sm:$0xff] %v1049_v11  ;;  %1055 = vst [vmem:[%s1892_s6 + $0x20] sm:$0xff] %v1039_v60  ;;  %v1050_v2 = vmax.f32 %v1032_v62, 0.0  ;;  %v1040_v3 = vmax.f32 %v992_v59, 0.0 }
 0x151   : > { %1063 = vst [vmem:[%s1892_s6 + $0x60] sm:$0xff] %v1047_v0  ;;  %1058 = vst [vmem:[%s1892_s6 + $0x38] sm:$0xff] %v1042_v1  ;;  %v1048_v61 = vmax.f32 %v1024_v13, 0.0 }
 0x152   : > { %1066 = vst [vmem:[%s1892_s6 + $0x78] sm:$0xff] %v1050_v2  ;;  %1056 = vst [vmem:[%s1892_s6 + $0x28] sm:$0xff] %v1040_v3 }
 0x153   : > { %1064 = vst [vmem:[%s1892_s6 + $0x68] sm:$0xff] %v1048_v61 }
 0x154   : > { %1560 = shalt.err (!%p1557_p3)
}
 0x155   : > { %s1561_s26 = scalar_lea.hbm %s1916_s11, 2048  ;;  %s1565_s29 = scalar_lea.hbm %s1971_s3, 8192 }
 0x156   : > { %p1562_p4 = scmp.ne.s32.totalorder %s1916_s11, %s1561_s26  ;;  %p1566_p9 = scmp.lt.u32.totalorder %s1916_s11, %s1971_s3 }
 0x157   : > { %p1567_p10 = scmp.lt.u32.totalorder %s1565_s29, %s1561_s26  ;;  %p1569_p12 = scmp.lt.u32.totalorder %s1561_s26, %s1916_s11 }
 0x158   : > { %p1563_p7 = pnand %p1562_p4, %p1672_p5 }
 0x159   : > { %p1568_p11 = por %p1567_p10, %p1566_p9 }
 0x15a   : > { %p1564_p8 = pneg %p1563_p7 }
 0x15b   : > { %p1570_p13 = por %p1569_p12, %p1568_p11 }
 0x15d   : > { %p1571_p0 = pnand %p1570_p13, %p1564_p8 }
 0x15f   : > { %1574 = shalt.err (!%p1571_p0)
}
 0x160   : > { %s1612_s5 = smov 128   ;;  %s1613_s9 = smov 8  }
 0x161   : > { %1414 = dma.vmem_to_hbm [thread:$0]  (%p1672_p5), %s1918_s8, 2048, %s1916_s11, %s1927_s17, %s1612_s5, %s1612_s5, %s1613_s9  }
 0x162 PF: > { %p1420_p1 = scmp.ge.s32.totalorder %s1609_s15, 2  ;;  %s1096_s6 = sand.u32 1, %s1597_s12  }
 0x163   : > { %s1097_s7 = scalar_lea.sflag [#allocation3], %s1096_s6 }
 0x164   : > { %p1417_p2 = pnand %p1420_p1, %p1676_p6 }
 0x166   : > { %1592 = dma.done.wait (!%p1417_p2), %s1097_s7, 2048  }
 0x167   : > { %1594 = vsyncadd (!%p1417_p2), %s1097_s7, 4294965248  ;;  %p13_p3 = scmp.ge.s32.totalorder %s1659_s18, 6   ;;  %s1974_s12 = smov %s1601_s13 }
 0x168   : > { %s1975_s13 = smov %s1605_s14  ;;  %s1976_s14 = smov %s1670_s21 }
 0x169   : > { %s1977_s15 = smov %s1659_s18  ;;  %15 = sbr.rel (!%p13_p3) target bundleno = 3 (0x3), region = 67 }
 0x170   :  { %1102 = vsyncpa [#allocation3], 1 }
 0x171   :  { %1104 = vsyncpa [#allocation3 + $0x1], 1 }

</bundles_post_ra>
